<compile_context>
chip_gen: v7x
topology: tpu7x:2x2x1
jax: 0.10.0
libtpu: 0.0.40
codegen_flags: <defaults>
</compile_context>

<pallas_src>
import functools

import numpy as np

import jax
import jax.numpy as jnp
from jax.experimental import pallas as pl
from jax.experimental.pallas import tpu as pltpu


# ----------------------------------------------------------------------------
# Pallas kernels
# ----------------------------------------------------------------------------
def _directnet_kernel(l2_ref, o_ref, *, inv_nhidden, do_abs):
    """Single DirectNet: out = layer2.sum(axis=-1) * (1/nhidden)  [optionally |.|].

    layer1 (all-ones, requires_grad=False in the PyTorch module) is the identity
    under the broadcast multiply, so it is intentionally not loaded.
    Keep the explicit f32 cast: bf16-safe and the fast path on v5e (no bf16 VPU).
    """
    acc = jnp.sum(l2_ref[...].astype(jnp.float32), axis=2) * inv_nhidden  # XLU reduce + VPU scale
    if do_abs:
        acc = jnp.abs(acc)
    o_ref[...] = acc.astype(o_ref.dtype)


def _fused_directnet_kernel(l2_ref, o_ref):
    """Fused DirectNets stacked along nin, 1/nhidden pre-folded into the weights.

    l2_ref: (total_nin, max_nout, max_nh)  zero-padded, pre-scaled layer2 stack
    o_ref:  (total_nin, max_nout)          float32
    Hidden/nout-axis zero padding contributes 0 to the sum, so results are exact.
    NOTE: this invariant holds only for the pure sum; do not move abs / other
    nonlinearities inside this kernel before slicing off the padded columns.
    """
    o_ref[...] = jnp.sum(l2_ref[...].astype(jnp.float32), axis=2)   # XLU reduce


# ----------------------------------------------------------------------------
# Cached kernel builders / wrappers
# ----------------------------------------------------------------------------
@functools.lru_cache(maxsize=None)
def _build_directnet_call(nin, nout, nh, dtype_name, nhidden, do_abs):
    """Build (once per signature) the jitted standalone DirectNet pallas_call."""
    del dtype_name  # part of the cache key only
    kernel = functools.partial(
        _directnet_kernel, inv_nhidden=1.0 / float(nhidden), do_abs=bool(do_abs))
    call = pl.pallas_call(
        kernel,
        out_shape=jax.ShapeDtypeStruct((nin, nout), jnp.float32),
        in_specs=[pl.BlockSpec(memory_space=pltpu.MemorySpace.VMEM)],
        out_specs=pl.BlockSpec(memory_space=pltpu.MemorySpace.VMEM),
        cost_estimate=pl.CostEstimate(
            flops=nin * nout * nh, transcendentals=0,
            bytes_accessed=nin * nout * nh * 4 + nin * nout * 4),
    )
    return jax.jit(call)


def directnet_forward(layer2, nhidden, do_abs=False):
    """Standalone (single-net) DirectNet.forward() as a cached gridless pallas_call."""
    nin, nout, nh = layer2.shape
    fn = _build_directnet_call(nin, nout, nh, str(layer2.dtype),
                               float(nhidden), bool(do_abs))
    return fn(layer2)


@jax.jit
def fused_directnet_forward(layer2_scaled_stacked):
    """One launch serving every DirectNet owned by an SKNet (scale pre-folded)."""
    n, p, h = layer2_scaled_stacked.shape
    return pl.pallas_call(
        _fused_directnet_kernel,
        out_shape=jax.ShapeDtypeStruct((n, p), jnp.float32),
        in_specs=[pl.BlockSpec(memory_space=pltpu.MemorySpace.VMEM)],
        out_specs=pl.BlockSpec(memory_space=pltpu.MemorySpace.VMEM),
        cost_estimate=pl.CostEstimate(
            flops=n * p * h, transcendentals=0,
            bytes_accessed=n * p * h * 4 + n * p * 4),
    )(layer2_scaled_stacked)


# ----------------------------------------------------------------------------
# DirectNet / SKNet (parameter setup + dict glue)
# ----------------------------------------------------------------------------
class DirectNet:
    def __init__(self, nin, nhidden, nout, key, dtype=jnp.float32, ini_std=0.5):
        assert nout is not None, "nout must be specified!"
        self.nin, self.nhidden, self.nout = nin, nhidden, nout
        # Mirrors torch: layer1 = ones (non-trainable), layer2 ~ N(0, ini_std).
        self.layer1 = jnp.ones((nin, 1, nhidden), dtype=dtype)   # identity in forward
        self.layer2 = (ini_std * jax.random.normal(key, (nin, nout, nhidden))).astype(dtype)

    def __call__(self, do_abs=False):
        return directnet_forward(self.layer2, self.nhidden, do_abs=do_abs)


class SKNet:
    def __init__(self, skint_types, onsite_types, soc_types,
                 hopping_neurons, onsite_neurons, soc_neurons=None,
                 onsite_index_dict=None, onsitemode='none',
                 dtype=jnp.float32, key=None, **kwargs):
        assert len(set(skint_types)) == len(skint_types)
        assert skint_types is not None
        if key is None:
            key = jax.random.PRNGKey(0)
        k_hop, k_onsite, k_soc = jax.random.split(key, 3)

        self.skint_types = skint_types
        self.onsitemode = onsitemode
        self.onsite_types = onsite_types
        self.soc_types = soc_types
        self.onsite_index_dict = onsite_index_dict

        self.hopping_net = DirectNet(
            nin=len(self.skint_types),
            nhidden=hopping_neurons.get('nhidden', 1),
            nout=hopping_neurons.get('nout'),
            ini_std=0.001, dtype=dtype, key=k_hop)

        if self.onsitemode.lower() == 'none':
            self.onsite_net = None
        elif self.onsitemode.lower() == 'strain':
            assert onsite_types is not None
            self.onsite_net = DirectNet(
                nin=len(self.onsite_types),
                nhidden=hopping_neurons.get('nhidden', 1),
                nout=hopping_neurons.get('nout'),
                ini_std=0.01, dtype=dtype, key=k_onsite)
        else:
            assert onsite_types is not None
            assert onsite_index_dict is not None
            self.onsite_net = DirectNet(
                nin=len(self.onsite_types),
                nhidden=onsite_neurons.get('nhidden', 1),
                nout=1, ini_std=0.01, dtype=dtype, key=k_onsite)

        if soc_neurons is not None:
            assert soc_types is not None
            self.soc_net = DirectNet(
                nin=len(self.soc_types),
                nhidden=soc_neurons.get('nhidden', 1),
                nout=1, ini_std=0.01, dtype=dtype, key=k_soc)
        else:
            self.soc_net = None

        # Packed stack + caches are derived LAZILY from the live layer2 tensors,
        # so parameter updates followed by invalidate() never use stale weights.
        self._layer2_scaled = None     # (total_nin, max_nout, max_nh) f32, 1/nh folded
        self._slices = None            # name -> (row_start, row_end, nout)
        self._dev_cache = None         # fused device result (jnp, f32)
        self._host_cache = None        # lazy host numpy copy of _dev_cache

    # -- packing / fused evaluation -------------------------------------------
    def _nets(self):
        nets = [('hopping', self.hopping_net)]
        if self.onsite_net is not None:
            nets.append(('onsite', self.onsite_net))
        if self.soc_net is not None:
            nets.append(('soc', self.soc_net))
        return nets

    def _repack(self):
        """Stack every owned DirectNet along nin; fold 1/nhidden into the weights.

        Padding along nout/nhidden is zero, which is exact for the sum-reduction
        performed in the fused kernel.  The stack is kept in float32 so the
        fused accumulation keeps full precision even for bf16 parameters.
        """
        nets = self._nets()
        max_nout = max(n.nout for _, n in nets)
        max_nh = max(n.nhidden for _, n in nets)
        padded, slices, row = [], {}, 0
        for name, n in nets:
            w = n.layer2.astype(jnp.float32) * (1.0 / float(n.nhidden))  # fold scale (one-time)
            padded.append(jnp.pad(
                w, ((0, 0), (0, max_nout - n.nout), (0, max_nh - n.nhidden))))
            slices[name] = (row, row + n.nin, n.nout)
            row += n.nin
        self._slices = slices
        self._layer2_scaled = jnp.concatenate(padded, axis=0)

    def invalidate(self):
        """Call after modifying any DirectNet.layer2; forces repack + recompute."""
        self._layer2_scaled = None
        self._slices = None
        self._dev_cache = None
        self._host_cache = None

    def _compute_all_device(self):
        """One fused Pallas launch; result cached ON DEVICE (no forced host sync)."""
        if self._dev_cache is None:
            if self._layer2_scaled is None:
                self._repack()
            self._dev_cache = fused_directnet_forward(self._layer2_scaled)
        return self._dev_cache

    def _host_all(self):
        """Lazy single device->host transfer (only when a host consumer needs it)."""
        if self._host_cache is None:
            self._host_cache = np.asarray(
                jax.block_until_ready(self._compute_all_device()))
        return self._host_cache

    def net_out_device(self, name):
        """Device-resident output for downstream JAX consumers (static slice)."""
        if self._slices is None:
            self._repack()
        s, e, nout = self._slices[name]
        return self._compute_all_device()[s:e, :nout]

    def _net_out(self, name):
        if self._slices is None:
            self._repack()
        s, e, nout = self._slices[name]
        return self._host_all()[s:e, :nout]

    # -- forward (same semantics / returned structure as the PyTorch module) --
    def forward(self, mode: str):
        if mode == 'hopping':
            out = self._net_out('hopping')
            self.hop_coeffdict = dict(zip(self.skint_types,
                                          [out[i] for i in range(out.shape[0])]))
            return self.hop_coeffdict
        elif mode == 'soc':
            out = np.abs(self._net_out('soc'))   # abs applied after slicing off padding
            soc_values = dict(zip(self.soc_types,
                                  [out[i] for i in range(out.shape[0])]))
            self.soc_value = {}
            for ia in self.onsite_index_dict:
                self.soc_value[ia] = np.stack(
                    [soc_values[itag][0] for itag in self.onsite_index_dict[ia]])
            return (self.soc_value, None)
        elif mode == 'onsite':
            if self.onsitemode.lower() == 'none':
                return (None, None)
            elif self.onsitemode.lower() == 'strain':
                out = self._net_out('onsite')
                self.onsite_coeffdict = dict(
                    zip(self.onsite_types, [out[i] for i in range(out.shape[0])]))
                return (None, self.onsite_coeffdict)
            else:
                out = self._net_out('onsite')
                onsite_values = dict(
                    zip(self.onsite_types, [out[i] for i in range(out.shape[0])]))
                self.onsite_value_formated = {}
                for ia in self.onsite_index_dict:
                    self.onsite_value_formated[ia] = np.stack(
                        [onsite_values[itag][0]
                         for itag in self.onsite_index_dict[ia]])
                return (self.onsite_value_formated, None)
        else:
            raise ValueError(f'Invalid mode: {mode}')

    def get_hop_coeff(self, skint_type):
        if not hasattr(self, 'hop_coeffdict'):
            self.forward(mode='hopping')
        return self.hop_coeffdict[skint_type]


# ----------------------------------------------------------------------------
# Demo / smoke test
# ----------------------------------------------------------------------------
if __name__ == "__main__":
    key = jax.random.PRNGKey(0)

    skint_types = ['N-N-2s-2s-0', 'N-N-2s-2p-0', 'N-N-2p-2p-0', 'B-N-2s-2s-0']
    onsite_types = ['N-2s-0', 'N-2p-0', 'B-2s-0', 'B-2p-0']
    soc_types = ['N-2s-0', 'N-2p-0', 'B-2s-0', 'B-2p-0']
    onsite_index_dict = {'N': ['N-2s-0', 'N-2p-0'], 'B': ['B-2s-0', 'B-2p-0']}

    hopping_neurons = {'nhidden': 32, 'nout': 4}   # e.g. varTang96 formula: nout=4
    onsite_neurons = {'nhidden': 32}
    soc_neurons = {'nhidden': 32}

    net = SKNet(skint_types=skint_types,
                onsite_types=onsite_types,
                soc_types=soc_types,
                hopping_neurons=hopping_neurons,
                onsite_neurons=onsite_neurons,
                soc_neurons=soc_neurons,
                onsite_index_dict=onsite_index_dict,
                onsitemode='uniform',
                key=key)

    # Device-resident path (no host sync): static slice of the fused result.
    hop_dev_fused = net.net_out_device('hopping')
    jax.block_until_ready(hop_dev_fused)

    # All three modes are served by the SAME fused Pallas launch; the host copy
    # is materialized lazily exactly once for the dict-of-rows outputs.
    hop = net.forward(mode='hopping')
    onsite_val, _ = net.forward(mode='onsite')
    soc_val, _ = net.forward(mode='soc')

    # Also exercise the standalone single-net cached kernel (called twice to
    # confirm the cached/jitted callable is reused without re-lowering).
    hop_dev = net.hopping_net()
    hop_dev = net.hopping_net()
    jax.block_until_ready(hop_dev)

    # Cross-check against plain-JAX references (which keep the layer1 multiply
    # for full fidelity with the PyTorch forward).
    def ref(n, do_abs=False):
        r = np.asarray((n.layer1 * n.layer2).astype(jnp.float32).sum(axis=2) / n.nhidden)
        return np.abs(r) if do_abs else r

    ref_hop = ref(net.hopping_net)
    got_hop = np.stack([hop[t] for t in skint_types])
    assert np.allclose(got_hop, ref_hop, atol=1e-6), "hopping mismatch (fused)"
    assert np.allclose(np.asarray(hop_dev_fused), ref_hop, atol=1e-6), "hopping mismatch (device slice)"
    assert np.allclose(np.asarray(hop_dev), ref_hop, atol=1e-6), "hopping mismatch (single)"

    ref_on = ref(net.onsite_net)
    assert np.allclose(onsite_val['N'], ref_on[0:2, 0], atol=1e-6), "onsite N mismatch"
    assert np.allclose(onsite_val['B'], ref_on[2:4, 0], atol=1e-6), "onsite B mismatch"

    ref_soc = ref(net.soc_net, do_abs=True)
    assert np.allclose(soc_val['N'], ref_soc[0:2, 0], atol=1e-6), "soc N mismatch"
    assert np.allclose(soc_val['B'], ref_soc[2:4, 0], atol=1e-6), "soc B mismatch"

    # Exercise invalidate(): perturb a parameter and confirm repack + recompute.
    net.hopping_net.layer2 = net.hopping_net.layer2 * 2.0
    net.invalidate()
    hop2 = net.forward(mode='hopping')
    got_hop2 = np.stack([hop2[t] for t in skint_types])
    assert np.allclose(got_hop2, 2.0 * ref_hop, atol=1e-6), "stale-repack regression"

    print("KERNEL_OK")
</pallas_src>

<mosaic_0001>
module attributes {stable_mosaic.version = 11 : i64} {
  func.func @_fused_directnet_kernel(%arg0: memref<12x4x32xf32, #tpu.memory_space<vmem>>, %arg1: memref<12x4xf32, #tpu.memory_space<vmem>>) attributes {dimension_semantics = [], scalar_prefetch = 0 : i64, scratch_operands = 0 : i64, tpu.core_type = #tpu.core_type<tc>} {
    %c0 = arith.constant 0 : index
    %c0_0 = arith.constant 0 : index
    %c0_1 = arith.constant 0 : index
    %0 = vector.load %arg0[%c0, %c0_0, %c0_1] : memref<12x4x32xf32, #tpu.memory_space<vmem>>, vector<12x4x32xf32>
    %cst = arith.constant dense<0.000000e+00> : vector<12x4xf32>
    %1 = vector.multi_reduction <add>, %0, %cst [2] : vector<12x4x32xf32> to vector<12x4xf32>
    %c0_2 = arith.constant 0 : index
    %c0_3 = arith.constant 0 : index
    %2 = vector.load %arg1[%c0_2, %c0_3] : memref<12x4xf32, #tpu.memory_space<vmem>>, vector<12x4xf32>
    tpu.vector_store %arg1[%c0_2, %c0_3], %1 {strides = array<i32>} : memref<12x4xf32, #tpu.memory_space<vmem>>, vector<12x4xf32>,
    return
  }
}

</mosaic_0001>

<bundles_post_ra>
// kernel: fused_directnet_forward.1
= control target key start
LH: loop header
LB: loop body
LE: loop exit
PB: predicated region body
PF: predicated region fallthrough
CT: control target
= control target key end

     0   :  { %6 = vsyncpa [#allocation3], 0  ;;  %s188_s6 = smov [#allocation2]   ;;  %s237_s0 = inlined_call_operand.hbm [shape: f32[12,4,32], index: 0, kind: input, shape index: {}]   ;;  %s238_s1 = inlined_call_operand.vmem [shape: f32[12,4], index: 1, kind: output, shape index: {}]  }
   0x1   :  { %s12_s7 = sshll.u32 %s188_s6, 4  ;;  %s164_s10 = scalar_lea.hbm %s237_s0, 768  ;;  %s13_s7 = int_to_ptr.vmem [resolvable:$true] %s12_s7 }
   0x2   :  { %p165_p0 = scmp.ne.s32.totalorder %s237_s0, %s164_s10  ;;  %p168_p1 = scmp.lt.u32.totalorder %s164_s10, %s237_s0 }
   0x4   :  { %p170_p2 = pnand %p168_p1, %p165_p0 }
   0x6   :  { %173 = shalt.err (!%p170_p2)
}
   0x7   :  { %s174_s15 = scalar_lea.vmem %s13_s7, 768  ;;  %p179_p4 = scmp.lt.s32.totalorder %s13_s7, %s13_s7 }
   0x8   :  { %p175_p3 = scmp.ne.s32.totalorder %s13_s7, %s174_s15  ;;  %p180_p5 = scmp.lt.s32.totalorder %s174_s15, %s174_s15 }
   0xa   :  { %p181_p6 = por %p180_p5, %p179_p4 }
   0xc   :  { %p182_p7 = pnand %p181_p6, %p175_p3 }
   0xe   :  { %185 = shalt.err (!%p182_p7)
}
   0xf   :  { %s189_s16 = smov 64   ;;  %s190_s17 = smov 4  }
  0x10   :  { %18 = dma.hbm_to_vmem [thread:$0]  %s237_s0, 768, %s13_s7, [#allocation3], %s189_s16, %s189_s16, %s190_s17  }
  0x11   :  { %186 = dma.done.wait [#allocation3], 768  }
  0x12   :  { %187 = vsyncadd [#allocation3], 4294966528  ;;  %vm34_vm0 = vcmask 257024   ;;  %v24_v0 = vld [vmem:[#allocation2 + $0x8] sm:$0xf]  ;;  %v83_v24 = vlaneseq  ;;  %vm133_vm1 = vcmask 1041409  }
  0x13   :  { %v22_v1 = vld [vmem:[#allocation2] sm:$0xf]  ;;  %v25_v2 = vld [vmem:[#allocation2 + $0xc] sm:$0xf]  ;;  %v41_v3 = vsel %vm34_vm0, %v24_v0, 0.0  ;;  %vm135_vm2 = vcmask 1042434  }
  0x14   :  { %v35_v4 = vsel %vm34_vm0, %v22_v1, 0.0  ;;  %v23_v5 = vld [vmem:[#allocation2 + $0x4] sm:$0xf]  ;;  %42 = vadd.xlane.f32.xlu1 %v41_v3  ;;  %v44_v6 = vsel %vm34_vm0, %v25_v2, 0.0  ;;  %v27_v8 = vld [vmem:[#allocation2 + $0x14] sm:$0xf] }
  0x15   :  { %36 = vadd.xlane.f32.xlu0 %v35_v4  ;;  %v38_v7 = vsel %vm34_vm0, %v23_v5, 0.0  ;;  %v26_v9 = vld [vmem:[#allocation2 + $0x10] sm:$0xf]  ;;  %v50_v10 = vsel %vm34_vm0, %v27_v8, 0.0  ;;  %v31_v12 = vld [vmem:[#allocation2 + $0x24] sm:$0xf] }
  0x16   :  { %v47_v11 = vsel %vm34_vm0, %v26_v9, 0.0  ;;  %v30_v13 = vld [vmem:[#allocation2 + $0x20] sm:$0xf]  ;;  %v62_v14 = vsel %vm34_vm0, %v31_v12, 0.0  ;;  %v32_v16 = vld [vmem:[#allocation2 + $0x28] sm:$0xf] }
  0x17   :  { %v59_v15 = vsel %vm34_vm0, %v30_v13, 0.0  ;;  %v28_v17 = vld [vmem:[#allocation2 + $0x18] sm:$0xf]  ;;  %v65_v18 = vsel %vm34_vm0, %v32_v16, 0.0  ;;  %v33_v20 = vld [vmem:[#allocation2 + $0x2c] sm:$0xf] }
  0x18   :  { %45 = vadd.xlane.f32.xlu1 %v44_v6  ;;  %v53_v19 = vsel %vm34_vm0, %v28_v17, 0.0  ;;  %v29_v21 = vld [vmem:[#allocation2 + $0x1c] sm:$0xf]  ;;  %v68_v22 = vsel %vm34_vm0, %v33_v20, 0.0  ;;  %v84_v25 = vand.u32 127, %v83_v24  ;;  %v86_v26 = vshrl.u32 %v83_v24, 7 }
  0x19   :  { %39 = vadd.xlane.f32.xlu0 %v38_v7  ;;  %v56_v23 = vsel %vm34_vm0, %v29_v21, 0.0  ;;  %vm137_vm3 = vcmask 1043459   ;;  %vm139_vm4 = vcmask 1044484   ;;  %vm141_vm5 = vcmask 1045509  }
  0x1a   :  { %v87_v29 = vsub.s32 %v84_v25, %v86_v26  ;;  %vm143_vm6 = vcmask 1046534   ;;  %vm154_vm7 = vcmask 27648   ;;  %vm145_vm8 = vcmask 1047559  }
  0x1b   :  { %vm152_vm9 = vcmask 31744  }
  0x1c   :  { %51 = vadd.xlane.f32.xlu1 %v50_v10 }
  0x1d   :  { %48 = vadd.xlane.f32.xlu0 %v47_v11 }
  0x20   :  { %63 = vadd.xlane.f32.xlu1 %v62_v14 }
  0x21   :  { %60 = vadd.xlane.f32.xlu0 %v59_v15 }
  0x24   :  { %66 = vadd.xlane.f32.xlu1 %v65_v18 }
  0x25   :  { %54 = vadd.xlane.f32.xlu0 %v53_v19 }
  0x28   :  { %69 = vadd.xlane.f32.xlu1 %v68_v22 }
  0x29   :  { %57 = vadd.xlane.f32.xlu0 %v56_v23 }
  0xa1   :  { %v43_v27 = vpop.xlane.xlu1 %42 }
  0xa2   :  { %v37_v28 = vpop.xlane.xlu0 %36  ;;  %v96_v37 = vrot.slane %v43_v27, %v87_v29 }
  0xa3   :  { %v88_v33 = vrot.slane %v37_v28, %v87_v29 }
  0xa5   :  { %v46_v30 = vpop.xlane.xlu1 %45 }
  0xa6   :  { %v40_v31 = vpop.xlane.xlu0 %39  ;;  %v100_v41 = vrot.slane %v46_v30, %v87_v29 }
  0xa7   :  { %v92_v32 = vrot.slane %v40_v31, %v87_v29 }
  0xa9   :  { %v52_v34 = vpop.xlane.xlu1 %51  ;;  %v134_v36 = vsel %vm133_vm1, %v92_v32, %v88_v33 }
  0xaa   :  { %v49_v35 = vpop.xlane.xlu0 %48  ;;  %v136_v38 = vsel %vm135_vm2, %v96_v37, %v134_v36  ;;  %v108_v46 = vrot.slane %v52_v34, %v87_v29 }
  0xab   :  { %v104_v42 = vrot.slane %v49_v35, %v87_v29  ;;  %v138_v43 = vsel %vm137_vm3, %v100_v41, %v136_v38 }
  0xad   :  { %v64_v39 = vpop.xlane.xlu1 %63  ;;  %v140_v49 = vsel %vm139_vm4, %v104_v42, %v138_v43 }
  0xae   :  { %v61_v40 = vpop.xlane.xlu0 %60  ;;  %v124_v47 = vrot.slane %v64_v39, %v87_v29  ;;  %v142_v55 = vsel %vm141_vm5, %v108_v46, %v140_v49 }
  0xaf   :  { %v120_v48 = vrot.slane %v61_v40, %v87_v29 }
  0xb1   :  { %v67_v44 = vpop.xlane.xlu1 %66  ;;  %v147_v54 = vsel %vm133_vm1, %v124_v47, %v120_v48 }
  0xb2   :  { %v55_v45 = vpop.xlane.xlu0 %54  ;;  %v128_v50 = vrot.slane %v67_v44, %v87_v29 }
  0xb3   :  { %v112_v51 = vrot.slane %v55_v45, %v87_v29 }
  0xb4   :  { %v148_v58 = vsel %vm135_vm2, %v128_v50, %v147_v54 }
  0xb5   :  { %v70_v52 = vpop.xlane.xlu1 %69  ;;  %v144_v59 = vsel %vm143_vm6, %v112_v51, %v142_v55 }
  0xb6   :  { %v58_v53 = vpop.xlane.xlu0 %57  ;;  %v132_v56 = vrot.slane %v70_v52, %v87_v29 }
  0xb7   :  { %v116_v57 = vrot.slane %v58_v53, %v87_v29 }
  0xb8   :  { %v149_v60 = vsel %vm137_vm3, %v132_v56, %v148_v58 }
  0xb9   :  { %v146_v61 = vsel %vm145_vm8, %v116_v57, %v144_v59  ;;  %155 = vst.msk [vmem:[%s238_s1 + $0x8] sm:$0xf] %vm154_vm7, %v149_v60 }
  0xba   :  { %153 = vst.msk [vmem:[%s238_s1] sm:$0xff] %vm152_vm9, %v146_v61 }
  0xbb   :  { %160 = vsyncpa [#allocation3], 1 }

</bundles_post_ra>
